<compile_context>
chip_gen: v7x
topology: tpu7x:2x2x1
jax: 0.10.0
libtpu: 0.0.40
codegen_flags: <defaults>
</compile_context>

<pallas_src>
from functools import partial

import jax
import jax.numpy as jnp
from jax.experimental import pallas as pl
from jax.experimental.pallas import tpu as pltpu

MAX_VALUE = 0.5
LANES = 128


def softmax2d_clamp_kernel(x_ref, o_ref):
    # Works for both block layouts: (1, C, t_r, 128) and (1, C, t_hw).
    # Channel axis is axis=1 in both cases.
    x = x_ref[...]
    m = jnp.max(x, axis=1, keepdims=True)                      # max over channels
    # Stage the exponentials in the output buffer: avoids a second full-block VMEM
    # temporary, which is what lets the spatial tile grow under the VMEM cap.
    o_ref[...] = jnp.exp(x - m).astype(o_ref.dtype)            # EUP
    e = o_ref[...].astype(jnp.float32)
    s = jnp.sum(e, axis=1, keepdims=True)                      # sum over channels
    # Exact division (not approx reciprocal): free here since the kernel is HBM-bound,
    # and it keeps parity with the PyTorch reference.
    o_ref[...] = jnp.minimum(e / s, MAX_VALUE).astype(o_ref.dtype)


def _sublane_multiple(dtype):
    # Minimum second-minor block multiple for the dtype (sublane packing):
    # f32 -> 8, bf16 -> 16, int8/fp8 -> 32.
    return max(8, 32 // max(1, dtype.itemsize))


def _vmem_limit_bytes():
    try:
        cap = int(pltpu.get_tpu_info().vmem_capacity_bytes)
    except Exception:
        cap = 64 * 1024 * 1024  # conservative fallback: v7x per-TC physical VMEM
    # ~3/4 of physical, capped at 64 MiB (-> 48 MiB on v7x, 64 MiB on v5e/v6e).
    return min(64 * 1024 * 1024, (cap * 3) // 4)


@partial(jax.jit, static_argnames=("tile_bytes",))
def softmax2d_clamp(x, *, tile_bytes=None):
    """x: (N, C, H, W) -> softmax over C at each (n,h,w), then clamp_max(MAX_VALUE)."""
    N, C, H, W = x.shape
    HW = H * W
    dtype = x.dtype
    itemsize = dtype.itemsize
    sub = _sublane_multiple(dtype)

    vmem_limit = _vmem_limit_bytes()
    if tile_bytes is None:
        # ~4 MiB input tiles: good on v5e (2-4 MiB), v6e (4-8 MiB), v7x (4-6 MiB);
        # 2x(in+out) double buffers + f32 temps comfortably fit under vmem_limit.
        tile_bytes = min(4 * 1024 * 1024, vmem_limit // 8)

    if HW % LANES == 0:
        # ---- lane-dense 4-D path: (N, C, R, 128); free reshape (contiguous) ----
        r_total = HW // LANES
        target_rows = max(sub, tile_bytes // (C * LANES * itemsize))
        if r_total <= target_rows:
            t_r = r_total                               # full extent (always allowed)
        else:
            t_r = max(sub, (target_rows // sub) * sub)  # sublane-aligned partial tile
        grid = (N, pl.cdiv(r_total, t_r))               # ragged last R block is masked
        x_in = x.reshape(N, C, r_total, LANES)
        out_shape = jax.ShapeDtypeStruct((N, C, r_total, LANES), dtype)
        in_spec = pl.BlockSpec((1, C, t_r, LANES), lambda n, r: (n, 0, r, 0))
        out_spec = pl.BlockSpec((1, C, t_r, LANES), lambda n, r: (n, 0, r, 0))
    else:
        # ---- 3-D path: (N, C, HW); ragged tail handled inside the pallas_call,
        # so no wrapper-side pad + unpad slice (saves up to 2 extra full HBM passes) ----
        target_cols = max(LANES, tile_bytes // (C * itemsize))
        if HW <= target_cols:
            t_hw = HW                                   # full extent (not required %128)
        else:
            t_hw = max(LANES, (target_cols // LANES) * LANES)
        grid = (N, pl.cdiv(HW, t_hw))                   # ragged last block is masked
        x_in = x.reshape(N, C, HW)
        out_shape = jax.ShapeDtypeStruct((N, C, HW), dtype)
        in_spec = pl.BlockSpec((1, C, t_hw), lambda n, r: (n, 0, r))
        out_spec = pl.BlockSpec((1, C, t_hw), lambda n, r: (n, 0, r))

    out = pl.pallas_call(
        softmax2d_clamp_kernel,
        out_shape=out_shape,
        grid_spec=pltpu.PrefetchScalarGridSpec(
            num_scalar_prefetch=0,
            grid=grid,
            in_specs=[in_spec],
            out_specs=out_spec,
        ),
        compiler_params=pltpu.CompilerParams(
            # both grid axes are fully independent -> megacore sharding on v7x
            dimension_semantics=("parallel", "parallel"),
            vmem_limit_bytes=vmem_limit,
        ),
    )(x_in)

    return out.reshape(N, C, H, W)


def _reference(x):
    return jnp.minimum(jax.nn.softmax(x, axis=1), MAX_VALUE)


if __name__ == "__main__":
    # 1) main shape from the module spec: aligned HW (16*16 = 256 = 2*128), 4-D path
    x = jax.random.normal(jax.random.PRNGKey(0), (2, 4, 16, 16), dtype=jnp.float32)
    y = softmax2d_clamp(x)
    jax.block_until_ready(y)
    assert jnp.allclose(y, _reference(x), atol=1e-4, rtol=1e-4), "mismatch (aligned path)"

    # 2) non-128-aligned HW (10*10 = 100): 3-D full-extent path, no pad / no slice
    x2 = jax.random.normal(jax.random.PRNGKey(1), (2, 4, 10, 10), dtype=jnp.float32)
    y2 = softmax2d_clamp(x2)
    jax.block_until_ready(y2)
    assert jnp.allclose(y2, _reference(x2), atol=1e-4, rtol=1e-4), "mismatch (3-D path)"

    # 3) force tiny tiles to exercise the masked ragged last block on both paths
    x3 = jax.random.normal(jax.random.PRNGKey(2), (1, 4, 16, 104), dtype=jnp.float32)
    y3 = softmax2d_clamp(x3, tile_bytes=8 * 4 * LANES * 4)      # 4-D path, ragged R block
    x4 = jax.random.normal(jax.random.PRNGKey(3), (1, 3, 20, 20), dtype=jnp.float32)
    y4 = softmax2d_clamp(x4, tile_bytes=LANES * 3 * 4)          # 3-D path, ragged tail block
    jax.block_until_ready((y3, y4))
    assert jnp.allclose(y3, _reference(x3), atol=1e-4, rtol=1e-4), "mismatch (ragged R)"
    assert jnp.allclose(y4, _reference(x4), atol=1e-4, rtol=1e-4), "mismatch (ragged tail)"

    print("KERNEL_OK")
</pallas_src>

<mosaic_0001>
module attributes {stable_mosaic.version = 11 : i64} {
  func.func @softmax2d_clamp_kernel(%arg0: i32, %arg1: i32, %arg2: memref<1x4x2x128xf32, #tpu.memory_space<vmem>>, %arg3: memref<1x4x2x128xf32, #tpu.memory_space<vmem>>) attributes {dimension_semantics = [#tpu.dimension_semantics<parallel>, #tpu.dimension_semantics<parallel>], iteration_bounds = array<i64: 2, 1>, scalar_prefetch = 0 : i64, scratch_operands = 0 : i64, tpu.core_type = #tpu.core_type<tc>, window_params = [{transform_indices = @transform_0, window_bounds = array<i64: 1, 4, 2, 128>}, {transform_indices = @transform_1, window_bounds = array<i64: 1, 4, 2, 128>}]} {
    %c0 = arith.constant 0 : index
    %c0_0 = arith.constant 0 : index
    %c0_1 = arith.constant 0 : index
    %c0_2 = arith.constant 0 : index
    %0 = vector.load %arg2[%c0, %c0_0, %c0_1, %c0_2] : memref<1x4x2x128xf32, #tpu.memory_space<vmem>>, vector<1x4x2x128xf32>
    %cst = arith.constant dense<0xFF800000> : vector<1x2x128xf32>
    %1 = vector.multi_reduction <maximumf>, %0, %cst [1] : vector<1x4x2x128xf32> to vector<1x2x128xf32>
    %2 = vector.shape_cast %1 : vector<1x2x128xf32> to vector<1x1x2x128xf32>
    %3 = vector.broadcast %2 : vector<1x1x2x128xf32> to vector<1x4x2x128xf32>
    %4 = arith.subf %0, %3 : vector<1x4x2x128xf32>
    %5 = math.exp %4 : vector<1x4x2x128xf32>
    %c0_3 = arith.constant 0 : index
    %c0_4 = arith.constant 0 : index
    %c0_5 = arith.constant 0 : index
    %c0_6 = arith.constant 0 : index
    %6 = vector.load %arg3[%c0_3, %c0_4, %c0_5, %c0_6] : memref<1x4x2x128xf32, #tpu.memory_space<vmem>>, vector<1x4x2x128xf32>
    tpu.vector_store %arg3[%c0_3, %c0_4, %c0_5, %c0_6], %5 {strides = array<i32>} : memref<1x4x2x128xf32, #tpu.memory_space<vmem>>, vector<1x4x2x128xf32>,
    %c0_7 = arith.constant 0 : index
    %c0_8 = arith.constant 0 : index
    %c0_9 = arith.constant 0 : index
    %c0_10 = arith.constant 0 : index
    %7 = vector.load %arg3[%c0_7, %c0_8, %c0_9, %c0_10] : memref<1x4x2x128xf32, #tpu.memory_space<vmem>>, vector<1x4x2x128xf32>
    %cst_11 = arith.constant dense<0.000000e+00> : vector<1x2x128xf32>
    %8 = vector.multi_reduction <add>, %7, %cst_11 [1] : vector<1x4x2x128xf32> to vector<1x2x128xf32>
    %9 = vector.shape_cast %8 : vector<1x2x128xf32> to vector<1x1x2x128xf32>
    %10 = vector.broadcast %9 : vector<1x1x2x128xf32> to vector<1x4x2x128xf32>
    %11 = arith.divf %7, %10 : vector<1x4x2x128xf32>
    %cst_12 = arith.constant 5.000000e-01 : f32
    %12 = vector.broadcast %cst_12 : f32 to vector<1x4x2x128xf32>
    %13 = arith.minimumf %11, %12 : vector<1x4x2x128xf32>
    %c0_13 = arith.constant 0 : index
    %c0_14 = arith.constant 0 : index
    %c0_15 = arith.constant 0 : index
    %c0_16 = arith.constant 0 : index
    %14 = vector.load %arg3[%c0_13, %c0_14, %c0_15, %c0_16] : memref<1x4x2x128xf32, #tpu.memory_space<vmem>>, vector<1x4x2x128xf32>
    tpu.vector_store %arg3[%c0_13, %c0_14, %c0_15, %c0_16], %13 {strides = array<i32>} : memref<1x4x2x128xf32, #tpu.memory_space<vmem>>, vector<1x4x2x128xf32>,
    return
  }
  func.func @transform_0(%arg0: i32, %arg1: i32) -> (i32, i32, i32, i32) {
    %c0_i32 = arith.constant 0 : i32
    %c0_i32_0 = arith.constant 0 : i32
    %c0_i32_1 = arith.constant 0 : i32
    return %arg0, %c0_i32, %arg1, %c0_i32_0 : i32, i32, i32, i32
  }
  func.func @transform_1(%arg0: i32, %arg1: i32) -> (i32, i32, i32, i32) {
    %c0_i32 = arith.constant 0 : i32
    %c0_i32_0 = arith.constant 0 : i32
    %c0_i32_1 = arith.constant 0 : i32
    return %arg0, %c0_i32, %arg1, %c0_i32_0 : i32, i32, i32, i32
  }
}

</mosaic_0001>

<bundles_post_ra>
// kernel: softmax2d_clamp.1
= control target key start
LH: loop header
LB: loop body
LE: loop exit
PB: predicated region body
PF: predicated region fallthrough
CT: control target
= control target key end

     0   :  { %s364_s6 = smov 0   ;;  %s366_s7 = smov 0   ;;  %s419_s0 = inlined_call_operand.vmem [shape: f32[2,4,2,128], index: 0, kind: input, shape index: {}]   ;;  %s420_s1 = inlined_call_operand.vmem [shape: f32[2,4,2,128], index: 1, kind: output, shape index: {}]  }
   0x1   :  { %s368_s8 = smov 0  }
   0x2 LB: > { %s23_s9 = sadd.s32 1, %s348_s7  ;;  %p287_p0 = scmp.ge.s32.totalorder %s352_s8, 1  ;;  %s352_s8 = sphi %s368_s8, %s11_s8   ;;  %s348_s7 = sphi %s366_s7, %s422_s7   ;;  %s344_s6 = sphi %s364_s6, %s421_s6  }
   0x3   : > { %p25_p1 = scmp.ge.s32.totalorder %s23_s9, 2  ;;  %p106_p2 = scmp.lt.s32.totalorder %s352_s8, 3 }
   0x5   : > { %s424_s9 = smov (%p25_p1, %s23_s9), 0  ;;  %p107_p3 = pnand %p287_p0, %p106_p2 }
   0x6   : > { %p132_p4 = scmp.lt.s32.totalorder (!%p107_p3), %s344_s6, 1  ;;  %vm152_vm0 = vcmask (!%p107_p3), 1041408  }
   0x7   : > { %110 = sbr.rel (%p107_p3) target bundleno = 72 (0x48), region = 24 }
   0xe   : > { %s426_s6 = smov (!%p132_p4, %s344_s6), 1 }
   0xf   : > { %s294_s10 = sshll.u32 %s426_s6, 3 }
  0x10   : > { %s139_s13 = scalar_lea.vmem %s419_s0, %s294_s10  ;;  %s392_s16 = scalar_lea.vmem %s420_s1, %s294_s10 }
  0x11   : > { %v148_v0 = vld [vmem:[%s139_s13] sm:$0x3]  ;;  %v149_v1 = vld [vmem:[%s139_s13 + $0x2] sm:$0x3]  ;;  %v150_v2 = vld [vmem:[%s139_s13 + $0x4] sm:$0x3] }
  0x12   : > { %v151_v3 = vld [vmem:[%s139_s13 + $0x6] sm:$0x3]  ;;  %v153_v4 = vsel %vm152_vm0, %v148_v0, -inf  ;;  %v154_v5 = vsel %vm152_vm0, %v149_v1, -inf  ;;  %v155_v6 = vsel %vm152_vm0, %v150_v2, -inf }
  0x13   : > { %v156_v7 = vsel %vm152_vm0, %v151_v3, -inf  ;;  %v157_v8 = vmax.f32 %v153_v4, %v154_v5 }
  0x14   : > { %v158_v9 = vmax.f32 %v155_v6, %v156_v7 }
  0x16   : > { %v159_v10 = vmax.f32 %v157_v8, %v158_v9 }
  0x18   : > { %v160_v11 = vsub.f32 %v148_v0, %v159_v10  ;;  %v161_v12 = vsub.f32 %v149_v1, %v159_v10  ;;  %v162_v13 = vsub.f32 %v150_v2, %v159_v10  ;;  %v163_v14 = vsub.f32 %v151_v3, %v159_v10 }
  0x1a   : > { %v164_v15 = vmul.f32 1.442695, %v160_v11  ;;  %v166_v16 = vmul.f32 1.442695, %v161_v12  ;;  %v168_v17 = vmul.f32 1.442695, %v162_v13 }
  0x1b   : > { %v170_v18 = vmul.f32 1.442695, %v163_v14 }
  0x1c   : > { %320 = vpow2.f32 %v164_v15 }
  0x1d   : > { %322 = vpow2.f32 %v166_v16 }
  0x1e   : > { %324 = vpow2.f32 %v168_v17 }
  0x1f   : > { %326 = vpow2.f32 %v170_v18 }
  0x26   : > { %v321_v19 = vpop.eup %320 }
  0x27   : > { %v323_v20 = vpop.eup %322  ;;  %172 = vst [vmem:[%s392_s16] sm:$0x3] %v321_v19 }
  0x28   : > { %v325_v21 = vpop.eup %324  ;;  %173 = vst [vmem:[%s392_s16 + $0x2] sm:$0x3] %v323_v20 }
  0x29   : > { %v327_v22 = vpop.eup %326  ;;  %174 = vst [vmem:[%s392_s16 + $0x4] sm:$0x3] %v325_v21 }
  0x2a   : > { %175 = vst [vmem:[%s392_s16 + $0x6] sm:$0x3] %v327_v22 }
  0x2e   : > { %v176_v23 = vld [vmem:[%s392_s16] sm:$0x3] }
  0x2f   : > { %v177_v24 = vld [vmem:[%s392_s16 + $0x2] sm:$0x3]  ;;  %v180_v25 = vsel %vm152_vm0, %v176_v23, 0.0 }
  0x30   : > { %v178_v26 = vld [vmem:[%s392_s16 + $0x4] sm:$0x3]  ;;  %v181_v27 = vsel %vm152_vm0, %v177_v24, 0.0 }
  0x31   : > { %v179_v28 = vld [vmem:[%s392_s16 + $0x6] sm:$0x3]  ;;  %v182_v29 = vadd.f32 %v181_v27, %v180_v25  ;;  %v183_v30 = vsel %vm152_vm0, %v178_v26, 0.0 }
  0x32   : > { %v185_v31 = vsel %vm152_vm0, %v179_v28, 0.0 }
  0x33   : > { %v184_v32 = vadd.f32 %v183_v30, %v182_v29 }
  0x35   : > { %v186_v33 = vadd.f32 %v185_v31, %v184_v32 }
  0x37   : > { %328 = vrcp.f32 %v186_v33 }
  0x41   : > { %v329_v34 = vpop.eup %328 }
  0x42   : > { %v188_v35 = vmul.f32 %v329_v34, %v176_v23  ;;  %v189_v36 = vmul.f32 %v329_v34, %v177_v24  ;;  %v190_v37 = vmul.f32 %v329_v34, %v178_v26  ;;  %v191_v38 = vmul.f32 %v329_v34, %v179_v28 }
  0x44   : > { %v192_v39 = vmin.f32 %v188_v35, 0.5  ;;  %v193_v40 = vmin.f32 %v189_v36, 0.5  ;;  %v194_v41 = vmin.f32 %v190_v37, 0.5  ;;  %v195_v42 = vmin.f32 %v191_v38, 0.5 }
  0x46   : > { %196 = vst [vmem:[%s392_s16] sm:$0x3] %v192_v39  ;;  %197 = vst [vmem:[%s392_s16 + $0x2] sm:$0x3] %v193_v40 }
  0x47   : > { %198 = vst [vmem:[%s392_s16 + $0x4] sm:$0x3] %v194_v41  ;;  %199 = vst [vmem:[%s392_s16 + $0x6] sm:$0x3] %v195_v42 }
  0x48 PF: > { %s11_s8 = sadd.s32 1, %s352_s8   ;;  %s421_s6 = smov %s348_s7 }
  0x49   : > { %p8_p5 = scmp.ge.s32.totalorder %s11_s8, 4   ;;  %s422_s7 = smov %s424_s9 }
  0x4b   :  { %10 = sbr.rel (!%p8_p5) target bundleno = 2 (0x2), region = 54 }

</bundles_post_ra>
